<compile_context>
chip_gen: v7x
topology: tpu7x:2x2x1
jax: 0.10.0
libtpu: 0.0.40
codegen_flags: <defaults>
</compile_context>

<pallas_src>
import math
from functools import partial

import jax
import jax.numpy as jnp
from jax.experimental import pallas as pl
from jax.experimental.pallas import tpu as pltpu


# ---------------------------------------------------------------------------
# generation-dependent tiling / VMEM budget
# ---------------------------------------------------------------------------

def _detect_vmem_capacity():
    try:
        info = pltpu.get_tpu_info()
        for attr in ("vmem_capacity_bytes", "vmem_bytes", "vmem_size_bytes"):
            v = getattr(info, attr, None)
            if v:
                return int(v)
    except Exception:
        pass
    return 64 * 1024 * 1024  # conservative default (v7x per-TC VMEM)


_VMEM_CAP = _detect_vmem_capacity()
_BIG_VMEM = _VMEM_CAP >= (100 << 20)          # v5e / v6e (128 MiB) vs v7x (64 MiB)
_VMEM_LIMIT = (96 << 20) if _BIG_VMEM else (48 << 20)
_MT_TARGET = 512 if _BIG_VMEM else 256        # row-tile target
_NT_TARGET = 512 if _BIG_VMEM else 256        # output-column tile target
_KT_TARGET = 512                              # reduction tile target
_HT_TARGET = 1024 if _BIG_VMEM else 512       # MLP hidden tile target
_LN_MT_TARGET = 1024 if _BIG_VMEM else 512


def _pick_tile(dim, target, aligns=(8,)):
    """Largest tile <= target that divides dim and is a multiple of one of
    `aligns` (tried in order); falls back to the full dim (full-extent blocks
    are exempt from the (8,128) rule)."""
    if dim <= target:
        return dim
    for align in aligns:
        t = (target // align) * align
        while t >= align:
            if dim % t == 0:
                return t
            t -= align
    return dim


def _pad_rows(x2d, mult=8):
    """Pad the row axis to a multiple of `mult` (wrapper slices the pad off)."""
    M = x2d.shape[0]
    Mp = -(-M // mult) * mult
    if Mp == M:
        return x2d
    return jnp.pad(x2d, ((0, Mp - M), (0, 0)))


# ---------------------------------------------------------------------------
# in-kernel math helpers (Python-scalar constants only -> no captured consts)
# ---------------------------------------------------------------------------

def _ln(x, g, b, eps):
    mu = jnp.mean(x, axis=-1, keepdims=True)
    xc = x - mu
    var = jnp.mean(xc * xc, axis=-1, keepdims=True)
    return xc * jax.lax.rsqrt(var + eps) * g + b


def _gelu_exact(x):
    # torch nn.GELU default is exact-erf GELU; erf via Abramowitz & Stegun
    # 7.1.26 polynomial (|err| <= 1.5e-7) so only Mosaic-friendly ops are used.
    # TODO(synk): switch to jax.lax.erf once Mosaic erf lowering is guaranteed.
    z = x * (1.0 / math.sqrt(2.0))
    sgn = jnp.where(z >= 0.0, 1.0, -1.0)
    a = jnp.abs(z)
    t = 1.0 / (1.0 + 0.3275911 * a)
    poly = ((((1.061405429 * t - 1.453152027) * t + 1.421413741) * t
             - 0.284496736) * t + 0.254829592) * t
    erf = sgn * (1.0 - poly * jnp.exp(-a * a))
    return 0.5 * x * (1.0 + erf)


def _softmax_lastdim(s):
    s = s - jnp.max(s, axis=-1, keepdims=True)
    p = jnp.exp(s)
    return p * pl.reciprocal(jnp.sum(p, axis=-1, keepdims=True), approx=True)


# ---------------------------------------------------------------------------
# Pallas kernels
# ---------------------------------------------------------------------------

def _linear_kernel(has_bias, has_res, x_ref, w_ref, *refs):
    idx = 0
    b_ref = r_ref = None
    if has_bias:
        b_ref = refs[idx]; idx += 1
    if has_res:
        r_ref = refs[idx]; idx += 1
    o_ref, acc_ref = refs[idx], refs[idx + 1]

    k = pl.program_id(2)

    @pl.when(k == 0)
    def _():
        acc_ref[...] = jnp.zeros_like(acc_ref)

    acc_ref[...] += jnp.dot(x_ref[...], w_ref[...],
                            preferred_element_type=jnp.float32)

    @pl.when(k == pl.num_programs(2) - 1)
    def _():
        out = acc_ref[...]
        if has_bias:
            out = out + b_ref[...]
        if has_res:
            out = out + r_ref[...].astype(jnp.float32)
        o_ref[...] = out.astype(o_ref.dtype)


def linear(x2d, w, b=None, residual=None):
    """y = x @ w (+ b) (+ residual).  x:(M,K) bf16, w:(K,N) bf16 -> (M,N) bf16."""
    x2d = x2d.astype(jnp.bfloat16)
    M0 = x2d.shape[0]
    x2d = _pad_rows(x2d)
    if residual is not None:
        residual = _pad_rows(residual.astype(jnp.bfloat16))
    M, K = x2d.shape
    N = w.shape[1]
    Mt = _pick_tile(M, _MT_TARGET, (8,))
    Nt = _pick_tile(N, _NT_TARGET, (256, 128))
    Kt = _pick_tile(K, _KT_TARGET, (256, 128))

    in_specs = [pl.BlockSpec((Mt, Kt), lambda i, j, k: (i, k)),
                pl.BlockSpec((Kt, Nt), lambda i, j, k: (k, j))]
    args = [x2d, w.astype(jnp.bfloat16)]
    if b is not None:
        in_specs.append(pl.BlockSpec((1, Nt), lambda i, j, k: (0, j)))
        args.append(b.reshape(1, N).astype(jnp.float32))
    if residual is not None:
        in_specs.append(pl.BlockSpec((Mt, Nt), lambda i, j, k: (i, j)))
        args.append(residual)

    out = pl.pallas_call(
        partial(_linear_kernel, b is not None, residual is not None),
        grid=(M // Mt, N // Nt, K // Kt),
        in_specs=in_specs,
        out_specs=pl.BlockSpec((Mt, Nt), lambda i, j, k: (i, j)),
        out_shape=jax.ShapeDtypeStruct((M, N), jnp.bfloat16),
        scratch_shapes=[pltpu.VMEM((Mt, Nt), jnp.float32)],
        compiler_params=pltpu.CompilerParams(
            dimension_semantics=("parallel", "parallel", "arbitrary"),
            vmem_limit_bytes=_VMEM_LIMIT),
    )(*args)
    return out[:M0]


def _layernorm_kernel(eps, x_ref, g_ref, b_ref, o_ref):
    x = x_ref[...].astype(jnp.float32)
    o_ref[...] = _ln(x, g_ref[...], b_ref[...], eps).astype(o_ref.dtype)


def layernorm(x2d, gamma, beta, eps):
    x2d = x2d.astype(jnp.bfloat16)
    M0 = x2d.shape[0]
    x2d = _pad_rows(x2d)
    M, D = x2d.shape
    Mt = _pick_tile(M, _LN_MT_TARGET, (8,))
    out = pl.pallas_call(
        partial(_layernorm_kernel, float(eps)),
        grid=(M // Mt,),
        in_specs=[pl.BlockSpec((Mt, D), lambda i: (i, 0)),
                  pl.BlockSpec((1, D), lambda i: (0, 0)),
                  pl.BlockSpec((1, D), lambda i: (0, 0))],
        out_specs=pl.BlockSpec((Mt, D), lambda i: (i, 0)),
        out_shape=jax.ShapeDtypeStruct((M, D), jnp.bfloat16),
        compiler_params=pltpu.CompilerParams(dimension_semantics=("parallel",)),
    )(x2d, gamma.reshape(1, D).astype(jnp.float32),
      beta.reshape(1, D).astype(jnp.float32))
    return out[:M0]


def _ln_linear_kernel(eps, has_bias, x_ref, g_ref, b_ref, w_ref, *refs):
    if has_bias:
        bias_ref, o_ref, h_ref = refs
    else:
        bias_ref = None
        o_ref, h_ref = refs

    # LayerNorm computed once per row tile (j == 0), reused for every column tile.
    @pl.when(pl.program_id(1) == 0)
    def _():
        x = x_ref[...].astype(jnp.float32)
        h_ref[...] = _ln(x, g_ref[...], b_ref[...], eps).astype(jnp.bfloat16)

    acc = jnp.dot(h_ref[...], w_ref[...], preferred_element_type=jnp.float32)
    if has_bias:
        acc = acc + bias_ref[...]
    o_ref[...] = acc.astype(o_ref.dtype)


def ln_linear(x2d, g, b, eps, w, bias=None):
    """y = LayerNorm(x) @ w (+ bias): LN fused into its consumer matmul."""
    x2d = x2d.astype(jnp.bfloat16)
    M0 = x2d.shape[0]
    x2d = _pad_rows(x2d)
    M, D = x2d.shape
    N = w.shape[1]
    Mt = _pick_tile(M, _MT_TARGET, (8,))
    Nt = _pick_tile(N, _NT_TARGET, (256, 128))

    in_specs = [pl.BlockSpec((Mt, D), lambda i, j: (i, 0)),
                pl.BlockSpec((1, D), lambda i, j: (0, 0)),
                pl.BlockSpec((1, D), lambda i, j: (0, 0)),
                pl.BlockSpec((D, Nt), lambda i, j: (0, j))]
    args = [x2d,
            g.reshape(1, D).astype(jnp.float32), b.reshape(1, D).astype(jnp.float32),
            w.astype(jnp.bfloat16)]
    if bias is not None:
        in_specs.append(pl.BlockSpec((1, Nt), lambda i, j: (0, j)))
        args.append(bias.reshape(1, N).astype(jnp.float32))

    out = pl.pallas_call(
        partial(_ln_linear_kernel, float(eps), bias is not None),
        grid=(M // Mt, N // Nt),
        in_specs=in_specs,
        out_specs=pl.BlockSpec((Mt, Nt), lambda i, j: (i, j)),
        out_shape=jax.ShapeDtypeStruct((M, N), jnp.bfloat16),
        scratch_shapes=[pltpu.VMEM((Mt, D), jnp.bfloat16)],
        # j axis "arbitrary": the per-row LN scratch is filled at j == 0 and
        # reused, so j must not be megacore-split.
        compiler_params=pltpu.CompilerParams(
            dimension_semantics=("parallel", "arbitrary"),
            vmem_limit_bytes=_VMEM_LIMIT),
    )(*args)
    return out[:M0]


def _ln_mlp_kernel(eps, x_ref, g_ref, b_ref, w1_ref, b1_ref, w2_ref, b2_ref,
                   o_ref, acc_ref, h_ref):
    h = pl.program_id(1)

    @pl.when(h == 0)
    def _():
        x = x_ref[...].astype(jnp.float32)
        h_ref[...] = _ln(x, g_ref[...], b_ref[...], eps).astype(jnp.bfloat16)
        acc_ref[...] = jnp.zeros_like(acc_ref)

    h1 = jnp.dot(h_ref[...], w1_ref[...],
                 preferred_element_type=jnp.float32) + b1_ref[...]
    h1 = _gelu_exact(h1)
    acc_ref[...] += jnp.dot(h1.astype(jnp.bfloat16), w2_ref[...],
                            preferred_element_type=jnp.float32)

    @pl.when(h == pl.num_programs(1) - 1)
    def _():
        out = acc_ref[...] + b2_ref[...] + x_ref[...].astype(jnp.float32)
        o_ref[...] = out.astype(o_ref.dtype)


def ln_mlp(x2d, g, b, eps, p):
    """x + fc2(GELU(fc1(LN(x)))) in one kernel, H tiled so only (D,Ht)/(Ht,D)
    weight slabs are resident; the hidden activation never touches HBM."""
    x2d = x2d.astype(jnp.bfloat16)
    M0 = x2d.shape[0]
    x2d = _pad_rows(x2d)
    M, D = x2d.shape
    H = p['fc1_w'].shape[1]
    Mt = _pick_tile(M, _MT_TARGET, (8,))
    Ht = _pick_tile(H, _HT_TARGET, (256, 128))

    out = pl.pallas_call(
        partial(_ln_mlp_kernel, float(eps)),
        grid=(M // Mt, H // Ht),
        in_specs=[pl.BlockSpec((Mt, D), lambda i, h: (i, 0)),
                  pl.BlockSpec((1, D), lambda i, h: (0, 0)),
                  pl.BlockSpec((1, D), lambda i, h: (0, 0)),
                  pl.BlockSpec((D, Ht), lambda i, h: (0, h)),
                  pl.BlockSpec((1, Ht), lambda i, h: (0, h)),
                  pl.BlockSpec((Ht, D), lambda i, h: (h, 0)),
                  pl.BlockSpec((1, D), lambda i, h: (0, 0))],
        out_specs=pl.BlockSpec((Mt, D), lambda i, h: (i, 0)),
        out_shape=jax.ShapeDtypeStruct((M, D), jnp.bfloat16),
        scratch_shapes=[pltpu.VMEM((Mt, D), jnp.float32),    # fc2 accumulator
                        pltpu.VMEM((Mt, D), jnp.bfloat16)],  # LN(x) reuse
        compiler_params=pltpu.CompilerParams(
            dimension_semantics=("parallel", "arbitrary"),
            vmem_limit_bytes=_VMEM_LIMIT),
    )(x2d,
      g.reshape(1, D).astype(jnp.float32), b.reshape(1, D).astype(jnp.float32),
      p['fc1_w'].astype(jnp.bfloat16), p['fc1_b'].reshape(1, H).astype(jnp.float32),
      p['fc2_w'].astype(jnp.bfloat16), p['fc2_b'].reshape(1, D).astype(jnp.float32))
    return out[:M0]


def _self_attn_kernel(num_heads, qkv_ref, o_ref):
    # qkv block: (1, N, 3*D) bf16, packed exactly like torch's qkv linear output
    # (q | k | v, heads contiguous along lanes).  The 1/sqrt(hd) scale was
    # folded into the q weights/bias at init time.  Per-head results are stored
    # directly into lane slices of o_ref (no concat -> bounded live ranges).
    D = o_ref.shape[-1]
    hd = D // num_heads
    qkv = qkv_ref[0]                       # (N, 3*D) bf16
    for h in range(num_heads):             # static unrolled loop (heads are few)
        q = qkv[:, h * hd:(h + 1) * hd]
        k = qkv[:, D + h * hd:D + (h + 1) * hd]
        v = qkv[:, 2 * D + h * hd:2 * D + (h + 1) * hd]
        s = jax.lax.dot_general(q, k, (((1,), (1,)), ((), ())),
                                preferred_element_type=jnp.float32)
        p = _softmax_lastdim(s)
        o = jnp.dot(p.astype(jnp.bfloat16), v, preferred_element_type=jnp.float32)
        o_ref[0, :, h * hd:(h + 1) * hd] = o.astype(o_ref.dtype)


def self_attn_core(qkv, num_heads):
    """qkv: (B, N, 3*D) bf16 -> attention output (B, N, D) bf16."""
    # TODO(synk): for v7x with tiny B, fold heads / query tiles into the grid
    # for more pipelining; at these sizes grid=(B,) keeps lane layouts dense.
    B, N, D3 = qkv.shape
    D = D3 // 3
    return pl.pallas_call(
        partial(_self_attn_kernel, num_heads),
        grid=(B,),
        in_specs=[pl.BlockSpec((1, N, D3), lambda b: (b, 0, 0))],
        out_specs=pl.BlockSpec((1, N, D), lambda b: (b, 0, 0)),
        out_shape=jax.ShapeDtypeStruct((B, N, D), jnp.bfloat16),
        compiler_params=pltpu.CompilerParams(dimension_semantics=("parallel",)),
    )(qkv.astype(jnp.bfloat16))


def _cross_attn_kernel(num_heads, q_ref, kv_ref, o_ref):
    D = o_ref.shape[-1]
    hd = D // num_heads
    qall = q_ref[0]                        # (N, D) bf16, scale folded into q_w
    kvall = kv_ref[0]                      # (N, 2*D) bf16: [k | v]
    for h in range(num_heads):
        q = qall[:, h * hd:(h + 1) * hd]
        k = kvall[:, h * hd:(h + 1) * hd]
        v = kvall[:, D + h * hd:D + (h + 1) * hd]
        s = jax.lax.dot_general(q, k, (((1,), (1,)), ((), ())),
                                preferred_element_type=jnp.float32)
        p = _softmax_lastdim(s)
        o = jnp.dot(p.astype(jnp.bfloat16), v, preferred_element_type=jnp.float32)
        o_ref[0, :, h * hd:(h + 1) * hd] = o.astype(o_ref.dtype)


def cross_attn_core(q, kv, num_heads):
    B, N, D = q.shape
    return pl.pallas_call(
        partial(_cross_attn_kernel, num_heads),
        grid=(B,),
        in_specs=[pl.BlockSpec((1, N, D), lambda b: (b, 0, 0)),
                  pl.BlockSpec((1, N, 2 * D), lambda b: (b, 0, 0))],
        out_specs=pl.BlockSpec((1, N, D), lambda b: (b, 0, 0)),
        out_shape=jax.ShapeDtypeStruct((B, N, D), jnp.bfloat16),
        compiler_params=pltpu.CompilerParams(dimension_semantics=("parallel",)),
    )(q.astype(jnp.bfloat16), kv.astype(jnp.bfloat16))


# ---------------------------------------------------------------------------
# Model pieces (thin plain-JAX glue around the Pallas kernels)
# ---------------------------------------------------------------------------

def self_attention_block(x, p, num_heads, ln_g, ln_b, eps):
    """x + proj(SelfAttn(LN(x))): LN fused into QKV, residual fused into proj."""
    B, N, D = x.shape
    x2d = x.reshape(B * N, D)
    qkv = ln_linear(x2d, ln_g, ln_b, eps, p['qkv_w'], p['qkv_b'])        # (BN, 3D)
    attn = self_attn_core(qkv.reshape(B, N, 3 * D), num_heads)           # (B, N, D)
    out = linear(attn.reshape(B * N, D), p['proj_w'], p['proj_b'], residual=x2d)
    return out.reshape(B, N, D)


def backbone_block(x, p, num_heads):
    """timm ViT block (pre-LN, eps=1e-6, LayerScale/DropPath = identity)."""
    x = self_attention_block(x, p['attn'], num_heads, p['ln1_g'], p['ln1_b'], 1e-6)
    B, N, D = x.shape
    x2d = ln_mlp(x.reshape(B * N, D), p['ln2_g'], p['ln2_b'], 1e-6, p['mlp'])
    return x2d.reshape(B, N, D)


def cross_block(x, ctx, p, num_heads):
    """pajigsaw CrossBlock (gamma=None, drop_path=0, rel_pos_bias=False adds 0)."""
    x = self_attention_block(x, p['attn'], num_heads, p['ln1_g'], p['ln1_b'], 1e-5)
    B, N, D = x.shape
    x2d = x.reshape(B * N, D)
    ctx2d = ctx.reshape(B * N, D)
    q = ln_linear(x2d, p['lncross_g'], p['lncross_b'], 1e-5, p['cross']['q_w'], None)
    kv = ln_linear(ctx2d, p['lnctx_g'], p['lnctx_b'], 1e-5, p['cross']['kv_w'], None)
    co = cross_attn_core(q.reshape(B, N, D), kv.reshape(B, N, 2 * D), num_heads)
    x2d = linear(co.reshape(B * N, D), p['cross']['proj_w'], p['cross']['proj_b'],
                 residual=x2d)
    x2d = ln_mlp(x2d, p['ln2_g'], p['ln2_b'], 1e-5, p['mlp'])
    return x2d.reshape(B, N, D)


def patch_embed(imgs, p, patch_size):
    """Conv2d(k=stride=patch) expressed as patchify + matmul.  imgs: NCHW."""
    # TODO(synk): the NCHW->token transpose is a one-time XLA transpose; it
    # could be fused into the patch-embed matmul via an index_map over patches.
    B2, C, H, W = imgs.shape
    ps = patch_size
    gh, gw = H // ps, W // ps
    # patch vector ordered (c, kh, kw) to match torch conv weight (out,in,kh,kw).flatten
    x = imgs.reshape(B2, C, gh, ps, gw, ps).transpose(0, 2, 4, 1, 3, 5)
    x = x.reshape(B2 * gh * gw, C * ps * ps)
    x = linear(x, p['w'], p['b'])
    return x.reshape(B2, gh * gw, -1)


def backbone_forward_features(imgs, params, cfg):
    x = patch_embed(imgs, params['patch_embed'], cfg['patch_size'])      # (B2, P, D)
    B2, P, D = x.shape
    cls = jnp.broadcast_to(params['cls_token'], (B2, 1, D)).astype(jnp.float32)
    x = jnp.concatenate([cls, x.astype(jnp.float32)], axis=1)            # (B2, N, D)
    x = (x + params['pos_embed']).astype(jnp.bfloat16)
    for blk in params['blocks']:
        x = backbone_block(x, blk, cfg['backbone_heads'])
    N = x.shape[1]
    x = layernorm(x.reshape(B2 * N, D), params['norm_g'], params['norm_b'], 1e-6)
    return x.reshape(B2, N, D)


def backbone_forward_head(x, params):
    cls = x[:, 0]                                   # global_pool='token'
    return linear(cls, params['head_w'], params['head_b'])


def vision_transformer_forward(images, params, cfg):
    """images: (B, IM, C, H, W) with IM == 2 (the jigsaw pair)."""
    B, IM, C, H, W = images.shape
    x = images.reshape(B * IM, C, H, W)
    x = backbone_forward_features(x, params['backbone'], cfg)
    x1, x2 = x[:B], x[B:2 * B]                      # matches torch split_with_sizes
    for blk in params['cross_blocks']:
        x2 = cross_block(x2, x1, blk, cfg['cross_heads'])
    return backbone_forward_head(x2, params['backbone']).astype(jnp.float32)


# ---------------------------------------------------------------------------
# Deterministic parameter init (synthetic stand-in for timm pretrained weights)
# TODO(synk): real model loads pretrained 'vit_base_patch16_224'; weights here
# are random but keep the exact parameter layout / dataflow.  The attention
# 1/sqrt(head_dim) scale is folded into the q weights/bias here (exact rewrite).
# ---------------------------------------------------------------------------

def init_params(key, cfg):
    D = cfg['embed_dim']
    H = int(D * cfg['mlp_ratio'])
    C, ps = cfg['in_chans'], cfg['patch_size']
    num_patches = (cfg['img_size'] // ps) ** 2
    N = num_patches + 1
    keys = iter(jax.random.split(key, 512))

    def nrm(shape, s=0.02):
        return jax.random.normal(next(keys), shape, jnp.float32) * s

    def ln():
        return jnp.ones((D,), jnp.float32), jnp.zeros((D,), jnp.float32)

    def qkv_weights(num_heads, with_bias):
        scale = float((D // num_heads) ** -0.5)
        w = nrm((D, 3 * D))
        w = w.at[:, :D].multiply(scale)           # fold q*scale into the weight
        b = None
        if with_bias:
            b = nrm((3 * D,))
            b = b.at[:D].multiply(scale)          # ...and into the q bias
        return w.astype(jnp.bfloat16), b

    def cross_q_weight(num_heads):
        scale = float((D // num_heads) ** -0.5)
        return (nrm((D, D)) * scale).astype(jnp.bfloat16)

    def w_mm(shape, s=0.02):
        return nrm(shape, s).astype(jnp.bfloat16)

    blocks = []
    for _ in range(cfg['depth']):
        g1, b1 = ln(); g2, b2 = ln()
        qkv_w, qkv_b = qkv_weights(cfg['backbone_heads'], with_bias=True)  # timm: qkv_bias=True
        blocks.append({
            'ln1_g': g1, 'ln1_b': b1,
            'attn': {'qkv_w': qkv_w, 'qkv_b': qkv_b,
                     'proj_w': w_mm((D, D)), 'proj_b': nrm((D,))},
            'ln2_g': g2, 'ln2_b': b2,
            'mlp': {'fc1_w': w_mm((D, H)), 'fc1_b': nrm((H,)),
                    'fc2_w': w_mm((H, D)), 'fc2_b': nrm((D,))},
        })

    gN, bN = ln()
    backbone = {
        'patch_embed': {'w': w_mm((C * ps * ps, D)), 'b': nrm((D,))},
        'cls_token': nrm((1, 1, D)),
        'pos_embed': nrm((1, N, D)),
        'blocks': blocks,
        'norm_g': gN, 'norm_b': bN,
        'head_w': w_mm((D, cfg['num_classes'])),
        'head_b': jnp.zeros((cfg['num_classes'],), jnp.float32),
    }

    cross_blocks = []
    for _ in range(cfg['cross_depth']):
        g1, b1 = ln(); gx, bx = ln(); gc, bc = ln(); g2, b2 = ln()
        qkv_w, _ = qkv_weights(cfg['cross_heads'], with_bias=False)        # qkv_bias=False
        cross_blocks.append({
            'ln1_g': g1, 'ln1_b': b1,
            'attn': {'qkv_w': qkv_w, 'qkv_b': None,
                     'proj_w': w_mm((D, D)), 'proj_b': nrm((D,))},
            'lncross_g': gx, 'lncross_b': bx,
            'lnctx_g': gc, 'lnctx_b': bc,
            'cross': {'q_w': cross_q_weight(cfg['cross_heads']),
                      'kv_w': w_mm((D, 2 * D)),
                      'proj_w': w_mm((D, D)), 'proj_b': nrm((D,))},
            'ln2_g': g2, 'ln2_b': b2,
            'mlp': {'fc1_w': w_mm((D, H)), 'fc1_b': nrm((H,)),
                    'fc2_w': w_mm((H, D)), 'fc2_b': nrm((D,))},
        })

    return {'backbone': backbone, 'cross_blocks': cross_blocks}


# ---------------------------------------------------------------------------

if __name__ == "__main__":
    cfg = dict(
        img_size=16, patch_size=8, in_chans=3,
        embed_dim=32, depth=2, cross_depth=2,
        backbone_heads=4, cross_heads=4,
        mlp_ratio=4.0, num_classes=8,
    )
    key = jax.random.PRNGKey(0)
    pkey, xkey = jax.random.split(key)
    params = init_params(pkey, cfg)
    # (B, IM, C, H, W) = (2, 2, 3, 16, 16): a pair of images per example (NCHW)
    images = jax.random.normal(
        xkey, (2, 2, cfg['in_chans'], cfg['img_size'], cfg['img_size']), jnp.float32)

    out = vision_transformer_forward(images, params, cfg)
    out = jax.block_until_ready(out)
    assert out.shape == (2, cfg['num_classes']), out.shape
    assert jnp.all(jnp.isfinite(out))
    print("KERNEL_OK")
</pallas_src>

<mosaic_0001>
module attributes {stable_mosaic.version = 11 : i64} {
  func.func @_linear_kernel(%arg0: i32, %arg1: i32, %arg2: i32, %arg3: memref<16x192xbf16, #tpu.memory_space<vmem>>, %arg4: memref<192x32xbf16, #tpu.memory_space<vmem>>, %arg5: memref<1x32xf32, #tpu.memory_space<vmem>>, %arg6: memref<16x32xbf16, #tpu.memory_space<vmem>>, %arg7: memref<16x32xf32, #tpu.memory_space<vmem>>) attributes {dimension_semantics = [#tpu.dimension_semantics<parallel>, #tpu.dimension_semantics<parallel>, #tpu.dimension_semantics<arbitrary>], iteration_bounds = array<i64: 1, 1, 1>, scalar_prefetch = 0 : i64, scratch_operands = 1 : i64, tpu.core_type = #tpu.core_type<tc>, window_params = [{transform_indices = @transform_0, window_bounds = array<i64: 16, 192>}, {transform_indices = @transform_1, window_bounds = array<i64: 192, 32>}, {transform_indices = @transform_2, window_bounds = array<i64: 1, 32>}, {transform_indices = @transform_3, window_bounds = array<i64: 16, 32>}]} {
    %c0_i32 = arith.constant 0 : i32
    %0 = arith.cmpi eq, %arg2, %c0_i32 : i32
    %1 = arith.extui %0 : i1 to i32
    %c0_i32_0 = arith.constant 0 : i32
    %2 = arith.cmpi ne, %1, %c0_i32_0 : i32
    scf.if %2 {
      %cst_10 = arith.constant 0.000000e+00 : f32
      %12 = vector.broadcast %cst_10 : f32 to vector<16x32xf32>
      %c0_11 = arith.constant 0 : index
      %c0_12 = arith.constant 0 : index
      %13 = vector.load %arg7[%c0_11, %c0_12] : memref<16x32xf32, #tpu.memory_space<vmem>>, vector<16x32xf32>
      tpu.vector_store %arg7[%c0_11, %c0_12], %12 {strides = array<i32>} : memref<16x32xf32, #tpu.memory_space<vmem>>, vector<16x32xf32>,
    } else {
    }
    %c0 = arith.constant 0 : index
    %c0_1 = arith.constant 0 : index
    %3 = vector.load %arg7[%c0, %c0_1] : memref<16x32xf32, #tpu.memory_space<vmem>>, vector<16x32xf32>
    %c0_2 = arith.constant 0 : index
    %c0_3 = arith.constant 0 : index
    %4 = vector.load %arg3[%c0_2, %c0_3] : memref<16x192xbf16, #tpu.memory_space<vmem>>, vector<16x192xbf16>
    %c0_4 = arith.constant 0 : index
    %c0_5 = arith.constant 0 : index
    %5 = vector.load %arg4[%c0_4, %c0_5] : memref<192x32xbf16, #tpu.memory_space<vmem>>, vector<192x32xbf16>
    %cst = arith.constant dense<0.000000e+00> : vector<16x32xf32>
    %6 = tpu.matmul %4, %5, %cst {dimension_numbers = #tpu.dot_dimension_numbers<[1], [0], [0], [1], [0, 0, 1, 1], [], []>} : vector<16x192xbf16>, vector<192x32xbf16>, vector<16x32xf32> -> vector<16x32xf32>
    %7 = arith.addf %3, %6 : vector<16x32xf32>
    %c0_6 = arith.constant 0 : index
    %c0_7 = arith.constant 0 : index
    %8 = vector.load %arg7[%c0_6, %c0_7] : memref<16x32xf32, #tpu.memory_space<vmem>>, vector<16x32xf32>
    tpu.vector_store %arg7[%c0_6, %c0_7], %7 {strides = array<i32>} : memref<16x32xf32, #tpu.memory_space<vmem>>, vector<16x32xf32>,
    %c0_i32_8 = arith.constant 0 : i32
    %9 = arith.cmpi eq, %arg2, %c0_i32_8 : i32
    %10 = arith.extui %9 : i1 to i32
    %c0_i32_9 = arith.constant 0 : i32
    %11 = arith.cmpi ne, %10, %c0_i32_9 : i32
    scf.if %11 {
      %c0_10 = arith.constant 0 : index
      %c0_11 = arith.constant 0 : index
      %12 = vector.load %arg7[%c0_10, %c0_11] : memref<16x32xf32, #tpu.memory_space<vmem>>, vector<16x32xf32>
      %c0_12 = arith.constant 0 : index
      %c0_13 = arith.constant 0 : index
      %13 = vector.load %arg5[%c0_12, %c0_13] : memref<1x32xf32, #tpu.memory_space<vmem>>, vector<1x32xf32>
      %14 = vector.broadcast %13 : vector<1x32xf32> to vector<16x32xf32>
      %15 = arith.addf %12, %14 : vector<16x32xf32>
      %16 = arith.truncf %15 : vector<16x32xf32> to vector<16x32xbf16>
      %c0_14 = arith.constant 0 : index
      %c0_15 = arith.constant 0 : index
      %17 = vector.load %arg6[%c0_14, %c0_15] : memref<16x32xbf16, #tpu.memory_space<vmem>>, vector<16x32xbf16>
      tpu.vector_store %arg6[%c0_14, %c0_15], %16 {strides = array<i32>} : memref<16x32xbf16, #tpu.memory_space<vmem>>, vector<16x32xbf16>,
    } else {
    }
    return
  }
  func.func @transform_0(%arg0: i32, %arg1: i32, %arg2: i32) -> (i32, i32) {
    %c0_i32 = arith.constant 0 : i32
    return %arg0, %arg2 : i32, i32
  }
  func.func @transform_1(%arg0: i32, %arg1: i32, %arg2: i32) -> (i32, i32) {
    %c0_i32 = arith.constant 0 : i32
    return %arg2, %arg1 : i32, i32
  }
  func.func @transform_2(%arg0: i32, %arg1: i32, %arg2: i32) -> (i32, i32) {
    %c0_i32 = arith.constant 0 : i32
    %c0_i32_0 = arith.constant 0 : i32
    return %c0_i32, %arg1 : i32, i32
  }
  func.func @transform_3(%arg0: i32, %arg1: i32, %arg2: i32) -> (i32, i32) {
    %c0_i32 = arith.constant 0 : i32
    return %arg0, %arg1 : i32, i32
  }
}

</mosaic_0001>

<bundles_post_ra>
// kernel: tpu_custom_call.1
= control target key start
LH: loop header
LB: loop body
LE: loop exit
PB: predicated region body
PF: predicated region fallthrough
CT: control target
= control target key end

     0   :  { %v287_v1 = vmov 0   ;;  %vm20_vm0 = vcmask 261120   ;;  %v288_v3 = vmov 0.0   ;;  %vm132_vm1 = vcmask 523264   ;;  %s373_s0 = inlined_call_operand.vmem [shape: bf16[16,192], index: 0, kind: input, shape index: {}]   ;;  %s374_s1 = inlined_call_operand.vmem [shape: bf16[192,32], index: 1, kind: input, shape index: {}]   ;;  %s375_s2 = inlined_call_operand.vmem [shape: f32[1,32], index: 2, kind: input, shape index: {}]   ;;  %s376_s3 = inlined_call_operand.hbm [shape: bf16[16,32], index: 3, kind: output, shape index: {}]  }
   0x1   :  { %v248_v0 = vld [vmem:[%s374_s1] sm:$0xff]   ;;  %136 = vmatprep.subr.bf16.mxu0 %v287_v1  ;;  %v249_v2 = vld [vmem:[%s374_s1 + $0x8] sm:$0xff]   ;;  %21 = vst.msk [vmem:[#allocation2] sm:$0xff] %vm20_vm0, %v288_v3  ;;  %22 = vst.msk [vmem:[#allocation2 + $0x8] sm:$0xff] %vm20_vm0, %v288_v3 }
   0x2   :  { %137 = vmatpush1.bf16.msra.mxu0 %v248_v0  ;;  %v250_v4 = vld [vmem:[%s374_s1 + $0x10] sm:$0xff]   ;;  %v251_v5 = vld [vmem:[%s374_s1 + $0x18] sm:$0xff]   ;;  %v262_v6 = vld [vmem:[%s373_s0 + $0x4] ss:$8 sps:$4 sm:$0xff]  }
   0x3   :  { %138 = vmatprep.subr.bf16.mxu0 %v287_v1 }
   0x6   :  { %139 = vmatpush1.bf16.msra.mxu0 %v249_v2 }
   0x7   :  { %140 = vmatprep.subr.bf16.mxu0 %v287_v1 }
   0xa   :  { %141 = vmatpush1.bf16.msra.mxu0 %v250_v4 }
   0xb   :  { %142 = vmatprep.subr.bf16.mxu0 %v287_v1 }
   0xc   :  { %8 = vsyncpa [#allocation4], 0  ;;  %v252_v7 = vld [vmem:[%s374_s1 + $0x20] sm:$0xff]   ;;  %237 = vmatprep.mubr.msk.bf16.mxu0 %vm132_vm1, %v262_v6  ;;  %v253_v8 = vld [vmem:[%s374_s1 + $0x28] sm:$0xff]   ;;  %vm204_vm2 = vcmask 257024  }
   0xd   :  { %v254_v9 = vld [vmem:[%s374_s1 + $0x30] sm:$0xff]   ;;  %v255_v10 = vld [vmem:[%s374_s1 + $0x38] sm:$0xff]   ;;  %v256_v11 = vld [vmem:[%s374_s1 + $0x40] sm:$0xff]  }
   0xe   :  { %143 = vmatpush1.bf16.msra.mxu0 %v251_v5  ;;  %v257_v12 = vld [vmem:[%s374_s1 + $0x48] sm:$0xff]   ;;  %v258_v13 = vld [vmem:[%s374_s1 + $0x50] sm:$0xff]   ;;  %v259_v14 = vld [vmem:[%s374_s1 + $0x58] sm:$0xff]  }
   0xf   :  { %144 = vmatprep.subr.bf16.mxu0 %v287_v1  ;;  %v260_v15 = vld [vmem:[%s373_s0] ss:$8 sps:$4 sm:$0xff]   ;;  %s289_s0 = smov [#allocation3]  }
  0x10   :  { %v23_v16 = vld [vmem:[#allocation2] sm:$0xff]  ;;  %v24_v18 = vld [vmem:[#allocation2 + $0x8] sm:$0xff]  ;;  %s212_s14 = sshll.u32 %s289_s0, 4  ;;  %s213_s14 = int_to_ptr.vmem [resolvable:$true] %s212_s14 }
  0x11   :  { %v238_v24 = vld [vmem:[%s375_s2] ss:$0 sm:$0xff]  ;;  %s263_s15 = scalar_lea.vmem %s213_s14, 128  ;;  %p268_p1 = scmp.lt.s32.totalorder %s213_s14, %s213_s14 }
  0x12   :  { %145 = vmatpush1.bf16.msra.mxu0 %v252_v7  ;;  %p264_p0 = scmp.ne.s32.totalorder %s213_s14, %s263_s15  ;;  %p269_p2 = scmp.lt.s32.totalorder %s263_s15, %s263_s15 }
  0x13   :  { %146 = vmatprep.subr.bf16.mxu0 %v287_v1 }
  0x14   :  { %p270_p3 = por %p269_p2, %p268_p1 }
  0x16   :  { %147 = vmatpush1.bf16.msra.mxu0 %v253_v8  ;;  %p271_p4 = pnand %p270_p3, %p264_p0 }
  0x17   :  { %148 = vmatprep.subr.bf16.mxu0 %v287_v1 }
  0x1a   :  { %149 = vmatpush1.bf16.msra.mxu0 %v254_v9 }
  0x1b   :  { %150 = vmatprep.subr.bf16.mxu0 %v287_v1 }
  0x1e   :  { %151 = vmatpush1.bf16.msra.mxu0 %v255_v10 }
  0x1f   :  { %152 = vmatprep.subr.bf16.mxu0 %v287_v1 }
  0x22   :  { %153 = vmatpush1.bf16.msra.mxu0 %v256_v11 }
  0x23   :  { %154 = vmatprep.subr.bf16.mxu0 %v287_v1 }
  0x26   :  { %155 = vmatpush1.bf16.msra.mxu0 %v257_v12 }
  0x27   :  { %156 = vmatprep.subr.bf16.mxu0 %v287_v1 }
  0x2a   :  { %157 = vmatpush1.bf16.msra.mxu0 %v258_v13 }
  0x2b   :  { %158 = vmatprep.subr.bf16.mxu0 %v287_v1 }
  0x2e   :  { %159 = vmatpush1.bf16.msra.mxu0 %v259_v14 }
  0x31   :  { %169 = vmatmul.mubr.bf16.vlgmr.msra.gmra.mrb[0].mxu0 %v260_v15 }
 0x104   :  { %v170_v17 = vpop.f32.mrb[0].mxu0 }
 0x105   :  { %v177_v19 = vadd.f32 %v170_v17, %v23_v16  ;;  %v172_v20 = vpop.f32.mrb[1].mxu0 }
 0x106   :  { %v173_v21 = vpop.f32.mrb[2].mxu0 }
 0x107   :  { %180 = vst.msk [vmem:[#allocation2] sm:$0xff] %vm20_vm0, %v177_v19  ;;  %v178_v22 = vadd.f32 %v173_v21, %v24_v18  ;;  %v175_v23 = vpop.f32.mrb[3].mxu0 }
 0x109   :  { %181 = vst.msk [vmem:[#allocation2 + $0x8] sm:$0xff] %vm20_vm0, %v178_v22 }
 0x10e   :  { %v185_v25 = vld [vmem:[#allocation2] sm:$0xff] }
 0x10f   :  { %v194_v26 = vadd.f32 %v238_v24, %v185_v25 }
 0x110   :  { %v186_v27 = vld [vmem:[#allocation2 + $0x8] sm:$0xff] }
 0x111   :  { %v195_v28 = vadd.f32 %v238_v24, %v186_v27  ;;  %v241_v29 = vpack.c.bf16 %v194_v26, %v194_v26 }
 0x113   :  { %v242_v30 = vpack.c.bf16 %v195_v28, %v195_v28  ;;  %205 = vst.msk [vmem:[#allocation3] sm:$0xf] %vm204_vm2, %v241_v29 }
 0x115   :  { %206 = vst.msk [vmem:[#allocation3 + $0x4] sm:$0xf] %vm204_vm2, %v242_v30 }
 0x116   :  { %274 = shalt.err (!%p271_p4)
}
 0x117   :  { %s275_s17 = scalar_lea.hbm %s376_s3, 128 }
 0x118   :  { %p276_p5 = scmp.ne.s32.totalorder %s376_s3, %s275_s17  ;;  %p279_p6 = scmp.lt.u32.totalorder %s275_s17, %s376_s3 }
 0x11a   :  { %p281_p7 = pnand %p279_p6, %p276_p5 }
 0x11c   :  { %284 = shalt.err (!%p281_p7)
}
 0x11d   :  { %s290_s22 = smov 64   ;;  %s291_s23 = smov 4  }
 0x11e   :  { %218 = dma.vmem_to_hbm [thread:$0]  %s213_s14, 128, %s376_s3, [#allocation4], %s290_s22, %s290_s22, %s291_s23  }
 0x11f   :  { %285 = dma.done.wait [#allocation4], 128  }
 0x120   :  { %286 = vsyncadd [#allocation4], 4294967168 }
 0x121   :  { %222 = vsyncpa [#allocation4], 1 }

</bundles_post_ra>
